<compile_context>
chip_gen: v7x
topology: tpu7x:2x2x1
jax: 0.10.0
libtpu: 0.0.40
codegen_flags: <defaults>
</compile_context>

<pallas_src>
import jax
import jax.numpy as jnp
import numpy as np
from jax.experimental import pallas as pl
from jax.experimental.pallas import tpu as pltpu  # noqa: F401  (kept for parity)

_LANE = 128


def _lstm_fusion_kernel(x_ref, y_ref, wx_ref, wy_ref, b_ref,
                        wfc_ref, bfc_ref, out_ref):
    # x/y arrive in the caller dtype (f32); cast only at the MXU boundary so
    # the sigmoid/tanh path below stays f32 (v5e has no bf16 VALU/EUP).
    x = x_ref[...].astype(wx_ref.dtype)
    y = y_ref[...].astype(wy_ref.dtype)

    # gates for i|g|o only; the f-gate columns were removed in prep (c0 == 0)
    # and the W_hh term is dropped (h0 == 0, seq_len == 1).
    gates = (jnp.dot(x, wx_ref[...], preferred_element_type=jnp.float32)
             + jnp.dot(y, wy_ref[...], preferred_element_type=jnp.float32)
             + b_ref[...])                                    # (B, 3H) f32

    H = gates.shape[1] // 3
    i_g = jax.nn.sigmoid(gates[:, 0 * H:1 * H])
    g_g = jnp.tanh(gates[:, 1 * H:2 * H])
    o_g = jax.nn.sigmoid(gates[:, 2 * H:3 * H])

    h = o_g * jnp.tanh(i_g * g_g)                             # (B, H) f32

    out_ref[...] = (jnp.dot(h.astype(wfc_ref.dtype), wfc_ref[...],
                            preferred_element_type=jnp.float32)
                    + bfc_ref[...])                           # (B, Op) f32


def prepare_lstm_fusion_params(params, dx, dy):
    """One-time weight preprocessing (do NOT call per forward).

    Valid only for the module's seq_len==1 / zero-initial-state usage, which
    makes the W_hh term and the forget-gate columns exactly zero contribution.
    """
    w_ih = jnp.asarray(params["w_ih"], jnp.float32)           # (4H, D)
    b_ih = jnp.asarray(params["b_ih"], jnp.float32)           # (4H,)
    b_hh = jnp.asarray(params["b_hh"], jnp.float32)           # (4H,)
    w_fc = jnp.asarray(params["w_fc"], jnp.float32)           # (O, H)
    b_fc = jnp.asarray(params["b_fc"], jnp.float32)           # (O,)

    h4, d = w_ih.shape
    assert h4 % 4 == 0 and d == dx + dy
    H = h4 // 4
    # Lane-aligned hidden dim keeps the in-kernel gate slices copy-free.
    assert H % _LANE == 0, "hidden dim must be a multiple of 128"
    O = w_fc.shape[0]

    # Keep only the i | g | o gate rows (PyTorch order is i, f, g, o).
    w_igo = jnp.concatenate([w_ih[:H], w_ih[2 * H:3 * H], w_ih[3 * H:]], axis=0)
    b_sum = b_ih + b_hh
    b_igo = jnp.concatenate([b_sum[:H], b_sum[2 * H:3 * H], b_sum[3 * H:]])

    # Split along the input dim so x and y feed the kernel without a concat.
    wx = w_igo[:, :dx].T                                      # (Dx, 3H)
    wy = w_igo[:, dx:].T                                      # (Dy, 3H)

    # Pad FC output dim up to a lane multiple for unmasked lane-dense stores.
    o_pad = ((O + _LANE - 1) // _LANE) * _LANE
    wfc_p = jnp.zeros((o_pad, H), jnp.float32).at[:O].set(w_fc)
    bfc_p = jnp.zeros((o_pad,), jnp.float32).at[:O].set(b_fc)

    return {
        "wx": wx.astype(jnp.bfloat16),                        # (Dx, 3H) bf16
        "wy": wy.astype(jnp.bfloat16),                        # (Dy, 3H) bf16
        "b": b_igo[None, :].astype(jnp.float32),              # (1, 3H)  f32
        "wfc": wfc_p.T.astype(jnp.bfloat16),                  # (H, Op)  bf16
        "bfc": bfc_p[None, :].astype(jnp.float32),            # (1, Op)  f32
        "dx": dx,
        "dy": dy,
        "hidden": H,
        "out_dim": O,
    }


def lstm_normal_fusion(x, y, prep):
    """Returns (x, y, output) exactly like LSTM_normal_Fusion.forward."""
    B, Dx = x.shape
    Dy = y.shape[1]
    assert Dx == prep["dx"] and Dy == prep["dy"]
    O = prep["out_dim"]
    wx, wy, b, wfc, bfc = prep["wx"], prep["wy"], prep["b"], prep["wfc"], prep["bfc"]
    H3 = wx.shape[1]
    H = prep["hidden"]
    Op = wfc.shape[1]

    def spec(shape):
        # Single block covering the whole array (no grid); legal even when
        # B < 8 because block_shape equals the full array dims.
        return pl.BlockSpec(shape, lambda: (0,) * len(shape))

    out_p = pl.pallas_call(
        _lstm_fusion_kernel,
        out_shape=jax.ShapeDtypeStruct((B, Op), jnp.float32),
        in_specs=[spec((B, Dx)),       # x  (f32, caller dtype)
                  spec((B, Dy)),       # y  (f32, caller dtype)
                  spec((Dx, H3)),      # i|g|o weights for x (bf16)
                  spec((Dy, H3)),      # i|g|o weights for y (bf16)
                  spec((1, H3)),       # folded bias (f32)
                  spec((H, Op)),       # FC weight, lane-padded (bf16)
                  spec((1, Op))],      # FC bias, lane-padded (f32)
        out_specs=spec((B, Op)),
    )(x, y, wx, wy, b, wfc, bfc)

    # Tiny slice to match the module's (B, O) output; if the consumer accepts
    # the lane-padded (B, Op) tensor, return out_p directly instead.
    return x, y, out_p[:, :O]


def _reference(x, y, params):
    fused = jnp.concatenate([x, y], axis=1)
    gates = fused @ params["w_ih"].T + params["b_ih"] + params["b_hh"]
    H = gates.shape[1] // 4
    i = jax.nn.sigmoid(gates[:, :H])
    g = jnp.tanh(gates[:, 2 * H:3 * H])
    o = jax.nn.sigmoid(gates[:, 3 * H:])
    h = o * jnp.tanh(i * g)
    return h @ params["w_fc"].T + params["b_fc"]


if __name__ == "__main__":
    # Small shapes consistent with the module: input_dim = Dx + Dy, hidden = 512.
    B, Dx, Dy, H, O = 4, 128, 128, 512, 100
    input_dim = Dx + Dy

    key = jax.random.PRNGKey(0)
    kx, ky, k1, k2, k3, k4, k5 = jax.random.split(key, 7)

    x = jax.random.normal(kx, (B, Dx), jnp.float32)
    y = jax.random.normal(ky, (B, Dy), jnp.float32)

    # Deterministic parameter init (PyTorch-style uniform(-1/sqrt(H), 1/sqrt(H))).
    s = 1.0 / np.sqrt(H)
    params = {
        "w_ih": jax.random.uniform(k1, (4 * H, input_dim), jnp.float32, -s, s),
        "b_ih": jax.random.uniform(k2, (4 * H,), jnp.float32, -s, s),
        "b_hh": jax.random.uniform(k3, (4 * H,), jnp.float32, -s, s),
        "w_fc": jax.random.uniform(k4, (O, H), jnp.float32, -s, s),
        "b_fc": jax.random.uniform(k5, (O,), jnp.float32, -s, s),
    }

    prep = prepare_lstm_fusion_params(params, Dx, Dy)   # once, outside hot path
    x_out, y_out, out = lstm_normal_fusion(x, y, prep)
    jax.block_until_ready(out)

    ref = _reference(x, y, params)
    # bf16 weights (and bf16 MXU inputs) with f32 accumulation -> relaxed tol.
    np.testing.assert_allclose(np.asarray(out), np.asarray(ref),
                               rtol=2e-2, atol=1e-2)
    assert out.shape == (B, O)
    assert x_out.shape == (B, Dx) and y_out.shape == (B, Dy)
    print("KERNEL_OK")
</pallas_src>

<mosaic_0001>
module attributes {stable_mosaic.version = 11 : i64} {
  func.func @_lstm_fusion_kernel(%arg0: memref<4x128xf32, #tpu.memory_space<vmem>>, %arg1: memref<4x128xf32, #tpu.memory_space<vmem>>, %arg2: memref<128x1536xbf16, #tpu.memory_space<vmem>>, %arg3: memref<128x1536xbf16, #tpu.memory_space<vmem>>, %arg4: memref<1x1536xf32, #tpu.memory_space<vmem>>, %arg5: memref<512x128xbf16, #tpu.memory_space<vmem>>, %arg6: memref<1x128xf32, #tpu.memory_space<vmem>>, %arg7: memref<4x128xf32, #tpu.memory_space<vmem>>) attributes {dimension_semantics = [], scalar_prefetch = 0 : i64, scratch_operands = 0 : i64, tpu.core_type = #tpu.core_type<tc>} {
    %c0 = arith.constant 0 : index
    %c0_0 = arith.constant 0 : index
    %0 = vector.load %arg0[%c0, %c0_0] : memref<4x128xf32, #tpu.memory_space<vmem>>, vector<4x128xf32>
    %1 = arith.truncf %0 : vector<4x128xf32> to vector<4x128xbf16>
    %c0_1 = arith.constant 0 : index
    %c0_2 = arith.constant 0 : index
    %2 = vector.load %arg1[%c0_1, %c0_2] : memref<4x128xf32, #tpu.memory_space<vmem>>, vector<4x128xf32>
    %3 = arith.truncf %2 : vector<4x128xf32> to vector<4x128xbf16>
    %c0_3 = arith.constant 0 : index
    %c0_4 = arith.constant 0 : index
    %4 = vector.load %arg2[%c0_3, %c0_4] : memref<128x1536xbf16, #tpu.memory_space<vmem>>, vector<128x1536xbf16>
    %cst = arith.constant dense<0.000000e+00> : vector<4x1536xf32>
    %5 = tpu.matmul %1, %4, %cst {dimension_numbers = #tpu.dot_dimension_numbers<[1], [0], [0], [1], [0, 0, 1, 1], [], []>} : vector<4x128xbf16>, vector<128x1536xbf16>, vector<4x1536xf32> -> vector<4x1536xf32>
    %c0_5 = arith.constant 0 : index
    %c0_6 = arith.constant 0 : index
    %6 = vector.load %arg3[%c0_5, %c0_6] : memref<128x1536xbf16, #tpu.memory_space<vmem>>, vector<128x1536xbf16>
    %cst_7 = arith.constant dense<0.000000e+00> : vector<4x1536xf32>
    %7 = tpu.matmul %3, %6, %cst_7 {dimension_numbers = #tpu.dot_dimension_numbers<[1], [0], [0], [1], [0, 0, 1, 1], [], []>} : vector<4x128xbf16>, vector<128x1536xbf16>, vector<4x1536xf32> -> vector<4x1536xf32>
    %8 = arith.addf %5, %7 : vector<4x1536xf32>
    %c0_8 = arith.constant 0 : index
    %c0_9 = arith.constant 0 : index
    %9 = vector.load %arg4[%c0_8, %c0_9] : memref<1x1536xf32, #tpu.memory_space<vmem>>, vector<1x1536xf32>
    %10 = vector.broadcast %9 : vector<1x1536xf32> to vector<4x1536xf32>
    %11 = arith.addf %8, %10 : vector<4x1536xf32>
    %12 = vector.extract_strided_slice %11 {offsets = [0, 0], sizes = [4, 512], strides = [1, 1]} : vector<4x1536xf32> to vector<4x512xf32>
    %13 = arith.negf %12 : vector<4x512xf32>
    %14 = math.exp %13 : vector<4x512xf32>
    %cst_10 = arith.constant 1.000000e+00 : f32
    %15 = vector.broadcast %cst_10 : f32 to vector<4x512xf32>
    %16 = arith.addf %15, %14 : vector<4x512xf32>
    %17 = arith.divf %15, %16 : vector<4x512xf32>
    %18 = vector.extract_strided_slice %11 {offsets = [0, 512], sizes = [4, 512], strides = [1, 1]} : vector<4x1536xf32> to vector<4x512xf32>
    %19 = math.tanh %18 : vector<4x512xf32>
    %20 = vector.extract_strided_slice %11 {offsets = [0, 1024], sizes = [4, 512], strides = [1, 1]} : vector<4x1536xf32> to vector<4x512xf32>
    %21 = arith.negf %20 : vector<4x512xf32>
    %22 = math.exp %21 : vector<4x512xf32>
    %cst_11 = arith.constant 1.000000e+00 : f32
    %23 = vector.broadcast %cst_11 : f32 to vector<4x512xf32>
    %24 = arith.addf %23, %22 : vector<4x512xf32>
    %25 = arith.divf %23, %24 : vector<4x512xf32>
    %26 = arith.mulf %17, %19 : vector<4x512xf32>
    %27 = math.tanh %26 : vector<4x512xf32>
    %28 = arith.mulf %25, %27 : vector<4x512xf32>
    %29 = arith.truncf %28 : vector<4x512xf32> to vector<4x512xbf16>
    %c0_12 = arith.constant 0 : index
    %c0_13 = arith.constant 0 : index
    %30 = vector.load %arg5[%c0_12, %c0_13] : memref<512x128xbf16, #tpu.memory_space<vmem>>, vector<512x128xbf16>
    %cst_14 = arith.constant dense<0.000000e+00> : vector<4x128xf32>
    %31 = tpu.matmul %29, %30, %cst_14 {dimension_numbers = #tpu.dot_dimension_numbers<[1], [0], [0], [1], [0, 0, 1, 1], [], []>} : vector<4x512xbf16>, vector<512x128xbf16>, vector<4x128xf32> -> vector<4x128xf32>
    %c0_15 = arith.constant 0 : index
    %c0_16 = arith.constant 0 : index
    %32 = vector.load %arg6[%c0_15, %c0_16] : memref<1x128xf32, #tpu.memory_space<vmem>>, vector<1x128xf32>
    %33 = vector.broadcast %32 : vector<1x128xf32> to vector<4x128xf32>
    %34 = arith.addf %31, %33 : vector<4x128xf32>
    %c0_17 = arith.constant 0 : index
    %c0_18 = arith.constant 0 : index
    %35 = vector.load %arg7[%c0_17, %c0_18] : memref<4x128xf32, #tpu.memory_space<vmem>>, vector<4x128xf32>
    tpu.vector_store %arg7[%c0_17, %c0_18], %34 {strides = array<i32>} : memref<4x128xf32, #tpu.memory_space<vmem>>, vector<4x128xf32>,
    return
  }
}

</mosaic_0001>

<bundles_post_ra>
// kernel: tpu_custom_call.1
= control target key start
LH: loop header
LB: loop body
LE: loop exit
PB: predicated region body
PF: predicated region fallthrough
CT: control target
= control target key end

     0   :  { %12 = vsyncpa [#allocation3], 0  ;;  %s3269_s0 = inlined_call_operand.hbm [shape: f32[4,128], index: 0, kind: input, shape index: {}]   ;;  %s3270_s1 = inlined_call_operand.hbm [shape: f32[4,128], index: 1, kind: input, shape index: {}]   ;;  %s3271_s2 = inlined_call_operand.hbm [shape: bf16[128,1536], index: 2, kind: input, shape index: {}]   ;;  %s3272_s3 = inlined_call_operand.hbm [shape: bf16[128,1536], index: 3, kind: input, shape index: {}]   ;;  %s3273_s4 = inlined_call_operand.vmem [shape: f32[1,1536], index: 4, kind: input, shape index: {}]   ;;  %s3274_s5 = inlined_call_operand.hbm [shape: bf16[512,128], index: 5, kind: input, shape index: {}]   ;;  %s3275_s6 = inlined_call_operand.vmem [shape: f32[1,128], index: 6, kind: input, shape index: {}]   ;;  %s3276_s7 = inlined_call_operand.hbm [shape: f32[4,128], index: 7, kind: output, shape index: {}]  }
   0x1   :  { %13 = vsyncpa [#allocation6], 0 }
   0x2   :  { %14 = vsyncpa [#allocation9], 0 }
   0x3   :  { %15 = vsyncpa [#allocation4], 0  ;;  %s3041_s24 = smov [#allocation5]   ;;  %s2901_s28 = scalar_lea.hbm %s3270_s1, 64 }
   0x4   :  { %s32_s25 = sshll.u32 %s3041_s24, 4  ;;  %p2902_p0 = scmp.ne.s32.totalorder %s3270_s1, %s2901_s28  ;;  %s33_s25 = int_to_ptr.vmem [resolvable:$true] %s32_s25 }
   0x5   :  { %p2905_p1 = scmp.lt.u32.totalorder %s2901_s28, %s3270_s1 }
   0x7   :  { %p2907_p2 = pnand %p2905_p1, %p2902_p0 }
   0x9   :  { %2910 = shalt.err (!%p2907_p2)
}
   0xa   :  { %s2911_s10 = scalar_lea.vmem %s33_s25, 64  ;;  %p2916_p4 = scmp.lt.s32.totalorder %s33_s25, %s33_s25 }
   0xb   :  { %p2912_p3 = scmp.ne.s32.totalorder %s33_s25, %s2911_s10  ;;  %p2917_p5 = scmp.lt.s32.totalorder %s2911_s10, %s2911_s10 }
   0xd   :  { %p2918_p6 = por %p2917_p5, %p2916_p4 }
   0xf   :  { %p2919_p7 = pnand %p2918_p6, %p2912_p3 }
  0x11   :  { %2922 = shalt.err (!%p2919_p7)
}
  0x12   :  { %35 = dma.hbm_to_vmem [thread:$0]  %s3270_s1, 64, %s33_s25, [#allocation6]  }
  0x13   :  { %s3042_s13 = smov [#allocation8]   ;;  %s3043_s15 = smov [#allocation2]  }
  0x14   :  { %s53_s14 = sshll.u32 %s3042_s13, 4  ;;  %s22_s16 = sshll.u32 %s3043_s15, 4  ;;  %s54_s14 = int_to_ptr.vmem [resolvable:$true] %s53_s14  ;;  %s23_s16 = int_to_ptr.vmem [resolvable:$true] %s22_s16 }
  0x15   :  { %s2923_s19 = scalar_lea.hbm %s3272_s3, 12288 }
  0x16   :  { %p2924_p8 = scmp.ne.s32.totalorder %s3272_s3, %s2923_s19  ;;  %p2927_p9 = scmp.lt.u32.totalorder %s2923_s19, %s3272_s3 }
  0x18   :  { %p2929_p10 = pnand %p2927_p9, %p2924_p8 }
  0x1a   :  { %2932 = shalt.err (!%p2929_p10)
}
  0x1b   :  { %s2933_s1 = scalar_lea.vmem %s54_s14, 12288  ;;  %p2938_p12 = scmp.lt.s32.totalorder %s54_s14, %s54_s14 }
  0x1c   :  { %p2934_p11 = scmp.ne.s32.totalorder %s54_s14, %s2933_s1  ;;  %p2939_p13 = scmp.lt.s32.totalorder %s2933_s1, %s2933_s1 }
  0x1e   :  { %p2940_p0 = por %p2939_p13, %p2938_p12 }
  0x20   :  { %p2941_p1 = pnand %p2940_p0, %p2934_p11 }
  0x22   :  { %2944 = shalt.err (!%p2941_p1)
}
  0x23   :  { %s3044_s24 = smov 768   ;;  %s3045_s25 = smov 48  }
  0x24   :  { %59 = dma.hbm_to_vmem [thread:$0]  %s3272_s3, 12288, %s54_s14, [#allocation9], %s3044_s24, %s3044_s24, %s3045_s25  }
  0x25   :  { %s2945_s30 = scalar_lea.hbm %s3269_s0, 64 }
  0x26   :  { %p2946_p2 = scmp.ne.s32.totalorder %s3269_s0, %s2945_s30  ;;  %p2949_p3 = scmp.lt.u32.totalorder %s2945_s30, %s3269_s0 }
  0x28   :  { %p2951_p4 = pnand %p2949_p3, %p2946_p2 }
  0x2a   :  { %2954 = shalt.err (!%p2951_p4)
}
  0x2b   :  { %s2955_s12 = scalar_lea.vmem %s23_s16, 64  ;;  %p2960_p6 = scmp.lt.s32.totalorder %s23_s16, %s23_s16 }
  0x2c   :  { %p2956_p5 = scmp.ne.s32.totalorder %s23_s16, %s2955_s12  ;;  %p2961_p7 = scmp.lt.s32.totalorder %s2955_s12, %s2955_s12 }
  0x2e   :  { %p2962_p8 = por %p2961_p7, %p2960_p6 }
  0x30   :  { %p2963_p9 = pnand %p2962_p8, %p2956_p5 }
  0x32   :  { %2966 = shalt.err (!%p2963_p9)
}
  0x33   :  { %25 = dma.hbm_to_vmem [thread:$0]  %s3269_s0, 64, %s23_s16, [#allocation3]  }
  0x34   :  { %s3046_s14 = smov [#allocation7]   ;;  %s3047_s17 = smov [#allocation10]  }
  0x35   :  { %s41_s15 = sshll.u32 %s3046_s14, 4  ;;  %s67_s18 = sshll.u32 %s3047_s17, 4  ;;  %s42_s15 = int_to_ptr.vmem [resolvable:$true] %s41_s15  ;;  %s68_s18 = int_to_ptr.vmem [resolvable:$true] %s67_s18 }
  0x36   :  { %s2967_s21 = scalar_lea.hbm %s3271_s2, 12288 }
  0x37   :  { %p2968_p10 = scmp.ne.s32.totalorder %s3271_s2, %s2967_s21  ;;  %p2971_p11 = scmp.lt.u32.totalorder %s2967_s21, %s3271_s2 }
  0x39   :  { %p2973_p12 = pnand %p2971_p11, %p2968_p10 }
  0x3b   :  { %2976 = shalt.err (!%p2973_p12)
}
  0x3c   :  { %s2977_s0 = scalar_lea.vmem %s42_s15, 12288  ;;  %p2982_p0 = scmp.lt.s32.totalorder %s42_s15, %s42_s15 }
  0x3d   :  { %p2978_p13 = scmp.ne.s32.totalorder %s42_s15, %s2977_s0  ;;  %p2983_p1 = scmp.lt.s32.totalorder %s2977_s0, %s2977_s0 }
  0x3f   :  { %p2984_p2 = por %p2983_p1, %p2982_p0 }
  0x41   :  { %p2985_p3 = pnand %p2984_p2, %p2978_p13 }
  0x43   :  { %2988 = shalt.err (!%p2985_p3)
}
  0x44   :  { %47 = dma.hbm_to_vmem [thread:$0]  %s3271_s2, 12288, %s42_s15, [#allocation6], %s3044_s24, %s3044_s24, %s3045_s25  }
  0x45   :  { %s2989_s30 = scalar_lea.hbm %s3274_s5, 4096 }
  0x46   :  { %p2990_p4 = scmp.ne.s32.totalorder %s3274_s5, %s2989_s30  ;;  %p2993_p5 = scmp.lt.u32.totalorder %s2989_s30, %s3274_s5 }
  0x48   :  { %p2995_p6 = pnand %p2993_p5, %p2990_p4 }
  0x4a   :  { %2998 = shalt.err (!%p2995_p6)
}
  0x4b   :  { %s2999_s12 = scalar_lea.vmem %s68_s18, 4096  ;;  %p3004_p8 = scmp.lt.s32.totalorder %s68_s18, %s68_s18 }
  0x4c   :  { %p3000_p7 = scmp.ne.s32.totalorder %s68_s18, %s2999_s12  ;;  %p3005_p9 = scmp.lt.s32.totalorder %s2999_s12, %s2999_s12 }
  0x4e   :  { %p3006_p10 = por %p3005_p9, %p3004_p8 }
  0x50   :  { %p3007_p11 = pnand %p3006_p10, %p3000_p7 }
  0x52   :  { %3010 = shalt.err (!%p3007_p11)
}
  0x53   :  { %s3048_s2 = smov 64   ;;  %s3049_s24 = smov 4  }
  0x54   :  { %73 = dma.hbm_to_vmem [thread:$0]  %s3274_s5, 4096, %s68_s18, [#allocation9], %s3048_s2, %s3048_s2, %s3049_s24  }
  0x55   :  { %3033 = dma.done.wait [#allocation3], 64  }
  0x56   :  { %3034 = vsyncadd [#allocation3], 4294967232 }
  0x57   :  { %3035 = dma.done.wait [#allocation6], 12352  }
  0x58   :  { %3036 = vsyncadd [#allocation6], 4294954944 }
  0x59   :  { %3037 = dma.done.wait [#allocation9], 16384  }
  0x5a   :  { %3038 = vsyncadd [#allocation9], 4294950912  ;;  %v3050_v0 = vmov 0   ;;  %v2533_v1 = vld [vmem:[#allocation8 + $0x4] ss:$48 sps:$4 sm:$0xff]   ;;  %s3051_s18 = smov [#allocation11]  }
  0x5b   :  { %800 = vmatprep.mubr.bf16.mxu0 %v3050_v0  ;;  %841 = vmatprep.mubr.bf16.mxu1 %v3050_v0  ;;  %v2535_v2 = vld [vmem:[#allocation8 + $0xc] ss:$48 sps:$4 sm:$0xff]   ;;  %v2537_v3 = vld [vmem:[#allocation8] ss:$48 sps:$4 sm:$0xff]   ;;  %v2538_v4 = vld [vmem:[#allocation8 + $0x8] ss:$48 sps:$4 sm:$0xff]  }
  0x5c   :  { %768 = vmatprep.subr.bf16.mxu0 %v2533_v1  ;;  %809 = vmatprep.subr.bf16.mxu1 %v2535_v2  ;;  %v2539_v5 = vld [vmem:[#allocation8 + $0x64] ss:$48 sps:$4 sm:$0xff]   ;;  %v2541_v6 = vld [vmem:[#allocation8 + $0x6c] ss:$48 sps:$4 sm:$0xff]   ;;  %v2543_v7 = vld [vmem:[#allocation8 + $0x60] ss:$48 sps:$4 sm:$0xff]  }
  0x5d   :  { %769 = vmatpush1.bf16.msra.mxu0 %v2537_v3  ;;  %810 = vmatpush1.bf16.msra.mxu1 %v2538_v4  ;;  %v2544_v8 = vld [vmem:[#allocation8 + $0x68] ss:$48 sps:$4 sm:$0xff]   ;;  %v2545_v9 = vld [vmem:[#allocation8 + $0xc4] ss:$48 sps:$4 sm:$0xff]   ;;  %v2547_v10 = vld [vmem:[#allocation8 + $0xcc] ss:$48 sps:$4 sm:$0xff]  }
  0x5e   :  { %770 = vmatprep.subr.bf16.mxu0 %v2539_v5  ;;  %811 = vmatprep.subr.bf16.mxu1 %v2541_v6  ;;  %v2549_v11 = vld [vmem:[#allocation8 + $0xc0] ss:$48 sps:$4 sm:$0xff]   ;;  %v2550_v12 = vld [vmem:[#allocation8 + $0xc8] ss:$48 sps:$4 sm:$0xff]   ;;  %v2551_v13 = vld [vmem:[#allocation8 + $0x124] ss:$48 sps:$4 sm:$0xff]  }
  0x5f   :  { %v2553_v14 = vld [vmem:[#allocation8 + $0x12c] ss:$48 sps:$4 sm:$0xff]   ;;  %v2555_v15 = vld [vmem:[#allocation8 + $0x120] ss:$48 sps:$4 sm:$0xff]   ;;  %v2556_v16 = vld [vmem:[#allocation8 + $0x128] ss:$48 sps:$4 sm:$0xff]  }
  0x60   :  { %v2557_v17 = vld [vmem:[#allocation8 + $0x184] ss:$48 sps:$4 sm:$0xff]   ;;  %v2559_v18 = vld [vmem:[#allocation8 + $0x18c] ss:$48 sps:$4 sm:$0xff]   ;;  %v2561_v19 = vld [vmem:[#allocation8 + $0x180] ss:$48 sps:$4 sm:$0xff]  }
  0x61   :  { %771 = vmatpush1.bf16.msra.mxu0 %v2543_v7  ;;  %812 = vmatpush1.bf16.msra.mxu1 %v2544_v8  ;;  %v2562_v20 = vld [vmem:[#allocation8 + $0x188] ss:$48 sps:$4 sm:$0xff]   ;;  %v2563_v21 = vld [vmem:[#allocation8 + $0x1e4] ss:$48 sps:$4 sm:$0xff]   ;;  %v2565_v22 = vld [vmem:[#allocation8 + $0x1ec] ss:$48 sps:$4 sm:$0xff]  }
  0x62   :  { %772 = vmatprep.subr.bf16.mxu0 %v2545_v9  ;;  %813 = vmatprep.subr.bf16.mxu1 %v2547_v10  ;;  %v2567_v23 = vld [vmem:[#allocation8 + $0x1e0] ss:$48 sps:$4 sm:$0xff]   ;;  %v2568_v24 = vld [vmem:[#allocation8 + $0x1e8] ss:$48 sps:$4 sm:$0xff]   ;;  %v2569_v25 = vld [vmem:[#allocation8 + $0x244] ss:$48 sps:$4 sm:$0xff]  }
  0x63   :  { %v2571_v26 = vld [vmem:[#allocation8 + $0x24c] ss:$48 sps:$4 sm:$0xff]   ;;  %v2573_v27 = vld [vmem:[#allocation8 + $0x240] ss:$48 sps:$4 sm:$0xff]   ;;  %v2574_v28 = vld [vmem:[#allocation8 + $0x248] ss:$48 sps:$4 sm:$0xff]  }
  0x64   :  { %v2575_v29 = vld [vmem:[#allocation8 + $0x2a4] ss:$48 sps:$4 sm:$0xff]   ;;  %v2577_v30 = vld [vmem:[#allocation8 + $0x2ac] ss:$48 sps:$4 sm:$0xff]   ;;  %v2579_v31 = vld [vmem:[#allocation8 + $0x2a0] ss:$48 sps:$4 sm:$0xff]  }
  0x65   :  { %773 = vmatpush1.bf16.msra.mxu0 %v2549_v11  ;;  %814 = vmatpush1.bf16.msra.mxu1 %v2550_v12  ;;  %v2580_v32 = vld [vmem:[#allocation8 + $0x2a8] ss:$48 sps:$4 sm:$0xff]   ;;  %v94_v33 = vld [vmem:[#allocation5] sm:$0xf]  ;;  %v2583_v34 = vld [vmem:[#allocation8 + $0x14] ss:$48 sps:$4 sm:$0xff]  }
  0x66   :  { %774 = vmatprep.subr.bf16.mxu0 %v2551_v13  ;;  %815 = vmatprep.subr.bf16.mxu1 %v2553_v14  ;;  %v2586_v35 = vld [vmem:[#allocation8 + $0x1c] ss:$48 sps:$4 sm:$0xff]   ;;  %v3160_v36 = vpack.c.bf16 %v94_v33, %v94_v33  ;;  %v2581_v37 = vld [vmem:[#allocation8 + $0x10] ss:$48 sps:$4 sm:$0xff]   ;;  %v2584_v38 = vld [vmem:[#allocation8 + $0x18] ss:$48 sps:$4 sm:$0xff]  }
  0x67   :  { %v2589_v39 = vld [vmem:[#allocation8 + $0x74] ss:$48 sps:$4 sm:$0xff]   ;;  %v2592_v40 = vld [vmem:[#allocation8 + $0x7c] ss:$48 sps:$4 sm:$0xff]   ;;  %v2587_v41 = vld [vmem:[#allocation8 + $0x70] ss:$48 sps:$4 sm:$0xff]  }
  0x68   :  { %v2590_v42 = vld [vmem:[#allocation8 + $0x78] ss:$48 sps:$4 sm:$0xff]   ;;  %v2595_v43 = vld [vmem:[#allocation8 + $0xd4] ss:$48 sps:$4 sm:$0xff]   ;;  %v2598_v44 = vld [vmem:[#allocation8 + $0xdc] ss:$48 sps:$4 sm:$0xff]  }
  0x69   :  { %775 = vmatpush1.bf16.msra.mxu0 %v2555_v15  ;;  %816 = vmatpush1.bf16.msra.mxu1 %v2556_v16  ;;  %v2593_v45 = vld [vmem:[#allocation8 + $0xd0] ss:$48 sps:$4 sm:$0xff]   ;;  %v2596_v46 = vld [vmem:[#allocation8 + $0xd8] ss:$48 sps:$4 sm:$0xff]   ;;  %v2601_v47 = vld [vmem:[#allocation8 + $0x134] ss:$48 sps:$4 sm:$0xff]  }
  0x6a   :  { %776 = vmatprep.subr.bf16.mxu0 %v2557_v17  ;;  %817 = vmatprep.subr.bf16.mxu1 %v2559_v18  ;;  %v2604_v48 = vld [vmem:[#allocation8 + $0x13c] ss:$48 sps:$4 sm:$0xff]   ;;  %v2599_v49 = vld [vmem:[#allocation8 + $0x130] ss:$48 sps:$4 sm:$0xff]   ;;  %v2602_v50 = vld [vmem:[#allocation8 + $0x138] ss:$48 sps:$4 sm:$0xff]  }
  0x6b   :  { %v2607_v51 = vld [vmem:[#allocation8 + $0x194] ss:$48 sps:$4 sm:$0xff]   ;;  %v2610_v52 = vld [vmem:[#allocation8 + $0x19c] ss:$48 sps:$4 sm:$0xff]   ;;  %v2605_v53 = vld [vmem:[#allocation8 + $0x190] ss:$48 sps:$4 sm:$0xff]  }
  0x6c   :  { %v2608_v54 = vld [vmem:[#allocation8 + $0x198] ss:$48 sps:$4 sm:$0xff]   ;;  %v2613_v55 = vld [vmem:[#allocation8 + $0x1f4] ss:$48 sps:$4 sm:$0xff]   ;;  %v2616_v56 = vld [vmem:[#allocation8 + $0x1fc] ss:$48 sps:$4 sm:$0xff]  }
  0x6d   :  { %777 = vmatpush1.bf16.msra.mxu0 %v2561_v19  ;;  %818 = vmatpush1.bf16.msra.mxu1 %v2562_v20  ;;  %v2611_v57 = vld [vmem:[#allocation8 + $0x1f0] ss:$48 sps:$4 sm:$0xff]   ;;  %v2614_v58 = vld [vmem:[#allocation8 + $0x1f8] ss:$48 sps:$4 sm:$0xff]   ;;  %v2619_v59 = vld [vmem:[#allocation8 + $0x254] ss:$48 sps:$4 sm:$0xff]  }
  0x6e   :  { %778 = vmatprep.subr.bf16.mxu0 %v2563_v21  ;;  %819 = vmatprep.subr.bf16.mxu1 %v2565_v22  ;;  %v2622_v60 = vld [vmem:[#allocation8 + $0x25c] ss:$48 sps:$4 sm:$0xff]   ;;  %v2617_v61 = vld [vmem:[#allocation8 + $0x250] ss:$48 sps:$4 sm:$0xff]   ;;  %v2620_v62 = vld [vmem:[#allocation8 + $0x258] ss:$48 sps:$4 sm:$0xff]  }
  0x6f   :  { %v2625_v63 = vld [vmem:[#allocation8 + $0x2b4] ss:$48 sps:$4 sm:$0xff]   ;;  %v2628_v1 = vld [vmem:[#allocation8 + $0x2bc] ss:$48 sps:$4 sm:$0xff]   ;;  %v2623_v2 = vld [vmem:[#allocation8 + $0x2b0] ss:$48 sps:$4 sm:$0xff]  }
  0x70   :  { %v2626_v3 = vld [vmem:[#allocation8 + $0x2b8] ss:$48 sps:$4 sm:$0xff]   ;;  %v2631_v4 = vld [vmem:[#allocation8 + $0x24] ss:$48 sps:$4 sm:$0xff]   ;;  %v2634_v5 = vld [vmem:[#allocation8 + $0x2c] ss:$48 sps:$4 sm:$0xff]  }
  0x71   :  { %779 = vmatpush1.bf16.msra.mxu0 %v2567_v23  ;;  %820 = vmatpush1.bf16.msra.mxu1 %v2568_v24  ;;  %v2629_v6 = vld [vmem:[#allocation8 + $0x20] ss:$48 sps:$4 sm:$0xff]   ;;  %v2632_v7 = vld [vmem:[#allocation8 + $0x28] ss:$48 sps:$4 sm:$0xff]   ;;  %v2637_v8 = vld [vmem:[#allocation8 + $0x84] ss:$48 sps:$4 sm:$0xff]  }
  0x72   :  { %780 = vmatprep.subr.bf16.mxu0 %v2569_v25  ;;  %821 = vmatprep.subr.bf16.mxu1 %v2571_v26  ;;  %v2640_v9 = vld [vmem:[#allocation8 + $0x8c] ss:$48 sps:$4 sm:$0xff]   ;;  %v2635_v10 = vld [vmem:[#allocation8 + $0x80] ss:$48 sps:$4 sm:$0xff]   ;;  %v2638_v11 = vld [vmem:[#allocation8 + $0x88] ss:$48 sps:$4 sm:$0xff]  }
  0x73   :  { %v2643_v12 = vld [vmem:[#allocation8 + $0xe4] ss:$48 sps:$4 sm:$0xff]   ;;  %v2646_v13 = vld [vmem:[#allocation8 + $0xec] ss:$48 sps:$4 sm:$0xff]   ;;  %v2641_v14 = vld [vmem:[#allocation8 + $0xe0] ss:$48 sps:$4 sm:$0xff]  }
  0x74   :  { %v2644_v15 = vld [vmem:[#allocation8 + $0xe8] ss:$48 sps:$4 sm:$0xff]   ;;  %v2649_v16 = vld [vmem:[#allocation8 + $0x144] ss:$48 sps:$4 sm:$0xff]   ;;  %v2652_v17 = vld [vmem:[#allocation8 + $0x14c] ss:$48 sps:$4 sm:$0xff]  }
  0x75   :  { %781 = vmatpush1.bf16.msra.mxu0 %v2573_v27  ;;  %822 = vmatpush1.bf16.msra.mxu1 %v2574_v28  ;;  %v2647_v18 = vld [vmem:[#allocation8 + $0x140] ss:$48 sps:$4 sm:$0xff]   ;;  %v2650_v19 = vld [vmem:[#allocation8 + $0x148] ss:$48 sps:$4 sm:$0xff]   ;;  %v2655_v20 = vld [vmem:[#allocation8 + $0x1a4] ss:$48 sps:$4 sm:$0xff]  }
  0x76   :  { %782 = vmatprep.subr.bf16.mxu0 %v2575_v29  ;;  %823 = vmatprep.subr.bf16.mxu1 %v2577_v30  ;;  %v2658_v21 = vld [vmem:[#allocation8 + $0x1ac] ss:$48 sps:$4 sm:$0xff]   ;;  %v2653_v22 = vld [vmem:[#allocation8 + $0x1a0] ss:$48 sps:$4 sm:$0xff]   ;;  %v2656_v23 = vld [vmem:[#allocation8 + $0x1a8] ss:$48 sps:$4 sm:$0xff]  }
  0x77   :  { %v2661_v24 = vld [vmem:[#allocation8 + $0x204] ss:$48 sps:$4 sm:$0xff]   ;;  %v2664_v25 = vld [vmem:[#allocation8 + $0x20c] ss:$48 sps:$4 sm:$0xff]   ;;  %v2659_v26 = vld [vmem:[#allocation8 + $0x200] ss:$48 sps:$4 sm:$0xff]  }
  0x78   :  { %v2662_v27 = vld [vmem:[#allocation8 + $0x208] ss:$48 sps:$4 sm:$0xff]   ;;  %v2667_v28 = vld [vmem:[#allocation8 + $0x264] ss:$48 sps:$4 sm:$0xff]   ;;  %v2670_v29 = vld [vmem:[#allocation8 + $0x26c] ss:$48 sps:$4 sm:$0xff]  }
  0x79   :  { %783 = vmatpush1.bf16.msra.mxu0 %v2579_v31  ;;  %824 = vmatpush1.bf16.msra.mxu1 %v2580_v32  ;;  %v2665_v30 = vld [vmem:[#allocation8 + $0x260] ss:$48 sps:$4 sm:$0xff]   ;;  %v2668_v31 = vld [vmem:[#allocation8 + $0x268] ss:$48 sps:$4 sm:$0xff]   ;;  %v2673_v32 = vld [vmem:[#allocation8 + $0x2c4] ss:$48 sps:$4 sm:$0xff]  }
  0x7a   :  { %850 = vmatprep.subr.bf16.mxu0 %v2583_v34  ;;  %891 = vmatprep.subr.bf16.mxu1 %v2586_v35  ;;  %v2676_v33 = vld [vmem:[#allocation8 + $0x2cc] ss:$48 sps:$4 sm:$0xff]   ;;  %v2671_v34 = vld [vmem:[#allocation8 + $0x2c0] ss:$48 sps:$4 sm:$0xff]   ;;  %v2674_v35 = vld [vmem:[#allocation8 + $0x2c8] ss:$48 sps:$4 sm:$0xff]  }
  0x7b   :  { %s2234_s19 = sshll.u32 %s3051_s18, 4  ;;  %s2235_s19 = int_to_ptr.vmem [resolvable:$true] %s2234_s19 }
  0x7c   :  { %801 = vmatmul.mubr.bf16.vlgmr.msra.gmra.mrb[0].mxu0 %v3160_v36  ;;  %842 = vmatmul.mubr.bf16.vlgmr.msra.gmra.mrb[0].mxu1 %v3160_v36  ;;  %s3011_s20 = scalar_lea.vmem %s2235_s19, 64  ;;  %p3016_p13 = scmp.lt.s32.totalorder %s2235_s19, %s2235_s19 }
  0x7d   :  { %851 = vmatpush1.bf16.msra.mxu0 %v2581_v37  ;;  %892 = vmatpush1.bf16.msra.mxu1 %v2584_v38  ;;  %v2679_v37 = vld [vmem:[#allocation7 + $0x4] ss:$48 sps:$4 sm:$0xff]   ;;  %v2682_v38 = vld [vmem:[#allocation7 + $0xc] ss:$48 sps:$4 sm:$0xff]   ;;  %p3012_p12 = scmp.ne.s32.totalorder %s2235_s19, %s3011_s20  ;;  %p3017_p0 = scmp.lt.s32.totalorder %s3011_s20, %s3011_s20 }
  0x7e   :  { %852 = vmatprep.subr.bf16.mxu0 %v2589_v39  ;;  %893 = vmatprep.subr.bf16.mxu1 %v2592_v40  ;;  %v2677_v39 = vld [vmem:[#allocation7] ss:$48 sps:$4 sm:$0xff]   ;;  %v2680_v40 = vld [vmem:[#allocation7 + $0x8] ss:$48 sps:$4 sm:$0xff]  }
  0x7f   :  { %882 = vmatprep.mubr.bf16.mxu0 %v3050_v0  ;;  %923 = vmatprep.mubr.bf16.mxu1 %v3050_v0  ;;  %p3018_p1 = por %p3017_p0, %p3016_p13 }
  0x81   :  { %853 = vmatpush1.bf16.msra.mxu0 %v2587_v41  ;;  %894 = vmatpush1.bf16.msra.mxu1 %v2590_v42  ;;  %v2685_v41 = vld [vmem:[#allocation7 + $0x64] ss:$48 sps:$4 sm:$0xff]   ;;  %v2688_v42 = vld [vmem:[#allocation7 + $0x6c] ss:$48 sps:$4 sm:$0xff]   ;;  %p3019_p2 = pnand %p3018_p1, %p3012_p12 }
  0x82   :  { %854 = vmatprep.subr.bf16.mxu0 %v2595_v43  ;;  %895 = vmatprep.subr.bf16.mxu1 %v2598_v44  ;;  %v2683_v43 = vld [vmem:[#allocation7 + $0x60] ss:$48 sps:$4 sm:$0xff]   ;;  %v2686_v44 = vld [vmem:[#allocation7 + $0x68] ss:$48 sps:$4 sm:$0xff]  }
  0x85   :  { %855 = vmatpush1.bf16.msra.mxu0 %v2593_v45  ;;  %896 = vmatpush1.bf16.msra.mxu1 %v2596_v46  ;;  %v2691_v45 = vld [vmem:[#allocation7 + $0xc4] ss:$48 sps:$4 sm:$0xff]   ;;  %v2694_v46 = vld [vmem:[#allocation7 + $0xcc] ss:$48 sps:$4 sm:$0xff]  }
  0x86   :  { %856 = vmatprep.subr.bf16.mxu0 %v2601_v47  ;;  %897 = vmatprep.subr.bf16.mxu1 %v2604_v48  ;;  %v2689_v47 = vld [vmem:[#allocation7 + $0xc0] ss:$48 sps:$4 sm:$0xff]   ;;  %v2692_v48 = vld [vmem:[#allocation7 + $0xc8] ss:$48 sps:$4 sm:$0xff]  }
  0x89   :  { %857 = vmatpush1.bf16.msra.mxu0 %v2599_v49  ;;  %898 = vmatpush1.bf16.msra.mxu1 %v2602_v50  ;;  %v2697_v49 = vld [vmem:[#allocation7 + $0x124] ss:$48 sps:$4 sm:$0xff]   ;;  %v2695_v50 = vld [vmem:[#allocation7 + $0x120] ss:$48 sps:$4 sm:$0xff]  }
  0x8a   :  { %858 = vmatprep.subr.bf16.mxu0 %v2607_v51  ;;  %899 = vmatprep.subr.bf16.mxu1 %v2610_v52  ;;  %v2698_v51 = vld [vmem:[#allocation7 + $0x128] ss:$48 sps:$4 sm:$0xff]   ;;  %v2703_v52 = vld [vmem:[#allocation7 + $0x184] ss:$48 sps:$4 sm:$0xff]  }
  0x8d   :  { %859 = vmatpush1.bf16.msra.mxu0 %v2605_v53  ;;  %900 = vmatpush1.bf16.msra.mxu1 %v2608_v54  ;;  %v2706_v53 = vld [vmem:[#allocation7 + $0x18c] ss:$48 sps:$4 sm:$0xff]   ;;  %v2701_v54 = vld [vmem:[#allocation7 + $0x180] ss:$48 sps:$4 sm:$0xff]  }
  0x8e   :  { %860 = vmatprep.subr.bf16.mxu0 %v2613_v55  ;;  %901 = vmatprep.subr.bf16.mxu1 %v2616_v56  ;;  %v2704_v55 = vld [vmem:[#allocation7 + $0x188] ss:$48 sps:$4 sm:$0xff]   ;;  %v2709_v56 = vld [vmem:[#allocation7 + $0x1e4] ss:$48 sps:$4 sm:$0xff]  }
  0x91   :  { %861 = vmatpush1.bf16.msra.mxu0 %v2611_v57  ;;  %902 = vmatpush1.bf16.msra.mxu1 %v2614_v58  ;;  %v2712_v57 = vld [vmem:[#allocation7 + $0x1ec] ss:$48 sps:$4 sm:$0xff]   ;;  %v2707_v58 = vld [vmem:[#allocation7 + $0x1e0] ss:$48 sps:$4 sm:$0xff]  }
  0x92   :  { %862 = vmatprep.subr.bf16.mxu0 %v2619_v59  ;;  %903 = vmatprep.subr.bf16.mxu1 %v2622_v60  ;;  %v2710_v59 = vld [vmem:[#allocation7 + $0x1e8] ss:$48 sps:$4 sm:$0xff]   ;;  %v2715_v60 = vld [vmem:[#allocation7 + $0x244] ss:$48 sps:$4 sm:$0xff]  }
  0x95   :  { %863 = vmatpush1.bf16.msra.mxu0 %v2617_v61  ;;  %904 = vmatpush1.bf16.msra.mxu1 %v2620_v62  ;;  %v2718_v61 = vld [vmem:[#allocation7 + $0x24c] ss:$48 sps:$4 sm:$0xff]   ;;  %v2713_v62 = vld [vmem:[#allocation7 + $0x240] ss:$48 sps:$4 sm:$0xff]  }
  0x96   :  { %864 = vmatprep.subr.bf16.mxu0 %v2625_v63  ;;  %905 = vmatprep.subr.bf16.mxu1 %v2628_v1  ;;  %v2716_v63 = vld [vmem:[#allocation7 + $0x248] ss:$48 sps:$4 sm:$0xff]   ;;  %v2721_v1 = vld [vmem:[#allocation7 + $0x2a4] ss:$48 sps:$4 sm:$0xff]  }
  0x99   :  { %865 = vmatpush1.bf16.msra.mxu0 %v2623_v2  ;;  %906 = vmatpush1.bf16.msra.mxu1 %v2626_v3  ;;  %v2724_v2 = vld [vmem:[#allocation7 + $0x2ac] ss:$48 sps:$4 sm:$0xff]   ;;  %v2719_v3 = vld [vmem:[#allocation7 + $0x2a0] ss:$48 sps:$4 sm:$0xff]  }
  0x9a   :  { %932 = vmatprep.subr.bf16.mxu0 %v2631_v4  ;;  %973 = vmatprep.subr.bf16.mxu1 %v2634_v5  ;;  %v2722_v4 = vld [vmem:[#allocation7 + $0x2a8] ss:$48 sps:$4 sm:$0xff]  }
  0x9b   :  { %v92_v5 = vld [vmem:[#allocation2] sm:$0xf] }
  0x9c   :  { %883 = vmatmul.mubr.bf16.vlgmr.msra.gmra.mrb[4].mxu0 %v3160_v36  ;;  %924 = vmatmul.mubr.bf16.vlgmr.msra.gmra.mrb[4].mxu1 %v3160_v36 }
  0x9d   :  { %933 = vmatpush1.bf16.msra.mxu0 %v2629_v6  ;;  %974 = vmatpush1.bf16.msra.mxu1 %v2632_v7  ;;  %v2727_v6 = vld [vmem:[#allocation7 + $0x14] ss:$48 sps:$4 sm:$0xff]   ;;  %v2730_v7 = vld [vmem:[#allocation7 + $0x1c] ss:$48 sps:$4 sm:$0xff]  }
  0x9e   :  { %934 = vmatprep.subr.bf16.mxu0 %v2637_v8  ;;  %975 = vmatprep.subr.bf16.mxu1 %v2640_v9  ;;  %v2725_v8 = vld [vmem:[#allocation7 + $0x10] ss:$48 sps:$4 sm:$0xff]   ;;  %v3174_v9 = vpack.c.bf16 %v92_v5, %v92_v5 }
  0x9f   :  { %964 = vmatprep.mubr.bf16.mxu0 %v3050_v0  ;;  %1005 = vmatprep.mubr.bf16.mxu1 %v3050_v0  ;;  %v2815_v5 = vld [vmem:[#allocation7 + $0x2c0] ss:$48 sps:$4 sm:$0xff]  }
  0xa1   :  { %935 = vmatpush1.bf16.msra.mxu0 %v2635_v10  ;;  %976 = vmatpush1.bf16.msra.mxu1 %v2638_v11  ;;  %v2728_v10 = vld [vmem:[#allocation7 + $0x18] ss:$48 sps:$4 sm:$0xff]   ;;  %v2733_v11 = vld [vmem:[#allocation7 + $0x74] ss:$48 sps:$4 sm:$0xff]  }
  0xa2   :  { %936 = vmatprep.subr.bf16.mxu0 %v2643_v12  ;;  %977 = vmatprep.subr.bf16.mxu1 %v2646_v13  ;;  %v2736_v12 = vld [vmem:[#allocation7 + $0x7c] ss:$48 sps:$4 sm:$0xff]   ;;  %v2731_v13 = vld [vmem:[#allocation7 + $0x70] ss:$48 sps:$4 sm:$0xff]  }
  0xa5   :  { %937 = vmatpush1.bf16.msra.mxu0 %v2641_v14  ;;  %978 = vmatpush1.bf16.msra.mxu1 %v2644_v15  ;;  %v2734_v14 = vld [vmem:[#allocation7 + $0x78] ss:$48 sps:$4 sm:$0xff]   ;;  %v2739_v15 = vld [vmem:[#allocation7 + $0xd4] ss:$48 sps:$4 sm:$0xff]  }
  0xa6   :  { %938 = vmatprep.subr.bf16.mxu0 %v2649_v16  ;;  %979 = vmatprep.subr.bf16.mxu1 %v2652_v17  ;;  %v2742_v16 = vld [vmem:[#allocation7 + $0xdc] ss:$48 sps:$4 sm:$0xff]   ;;  %v2737_v17 = vld [vmem:[#allocation7 + $0xd0] ss:$48 sps:$4 sm:$0xff]  }
  0xa9   :  { %939 = vmatpush1.bf16.msra.mxu0 %v2647_v18  ;;  %980 = vmatpush1.bf16.msra.mxu1 %v2650_v19  ;;  %v2740_v18 = vld [vmem:[#allocation7 + $0xd8] ss:$48 sps:$4 sm:$0xff]   ;;  %v2745_v19 = vld [vmem:[#allocation7 + $0x134] ss:$48 sps:$4 sm:$0xff]  }
  0xaa   :  { %940 = vmatprep.subr.bf16.mxu0 %v2655_v20  ;;  %981 = vmatprep.subr.bf16.mxu1 %v2658_v21  ;;  %v2748_v20 = vld [vmem:[#allocation7 + $0x13c] ss:$48 sps:$4 sm:$0xff]   ;;  %v2743_v21 = vld [vmem:[#allocation7 + $0x130] ss:$48 sps:$4 sm:$0xff]  }
  0xad   :  { %941 = vmatpush1.bf16.msra.mxu0 %v2653_v22  ;;  %982 = vmatpush1.bf16.msra.mxu1 %v2656_v23  ;;  %v2746_v22 = vld [vmem:[#allocation7 + $0x138] ss:$48 sps:$4 sm:$0xff]   ;;  %v2751_v23 = vld [vmem:[#allocation7 + $0x194] ss:$48 sps:$4 sm:$0xff]  }
  0xae   :  { %942 = vmatprep.subr.bf16.mxu0 %v2661_v24  ;;  %983 = vmatprep.subr.bf16.mxu1 %v2664_v25  ;;  %v2754_v24 = vld [vmem:[#allocation7 + $0x19c] ss:$48 sps:$4 sm:$0xff]   ;;  %v2749_v25 = vld [vmem:[#allocation7 + $0x190] ss:$48 sps:$4 sm:$0xff]  }
  0xb1   :  { %943 = vmatpush1.bf16.msra.mxu0 %v2659_v26  ;;  %984 = vmatpush1.bf16.msra.mxu1 %v2662_v27  ;;  %v2752_v26 = vld [vmem:[#allocation7 + $0x198] ss:$48 sps:$4 sm:$0xff]   ;;  %v2757_v27 = vld [vmem:[#allocation7 + $0x1f4] ss:$48 sps:$4 sm:$0xff]  }
  0xb2   :  { %944 = vmatprep.subr.bf16.mxu0 %v2667_v28  ;;  %985 = vmatprep.subr.bf16.mxu1 %v2670_v29  ;;  %v2760_v28 = vld [vmem:[#allocation7 + $0x1fc] ss:$48 sps:$4 sm:$0xff]   ;;  %v2755_v29 = vld [vmem:[#allocation7 + $0x1f0] ss:$48 sps:$4 sm:$0xff]  }
  0xb5   :  { %945 = vmatpush1.bf16.msra.mxu0 %v2665_v30  ;;  %986 = vmatpush1.bf16.msra.mxu1 %v2668_v31  ;;  %v2758_v30 = vld [vmem:[#allocation7 + $0x1f8] ss:$48 sps:$4 sm:$0xff]   ;;  %v2763_v31 = vld [vmem:[#allocation7 + $0x254] ss:$48 sps:$4 sm:$0xff]  }
  0xb6   :  { %946 = vmatprep.subr.bf16.mxu0 %v2673_v32  ;;  %987 = vmatprep.subr.bf16.mxu1 %v2676_v33  ;;  %v2766_v32 = vld [vmem:[#allocation7 + $0x25c] ss:$48 sps:$4 sm:$0xff]   ;;  %v2761_v33 = vld [vmem:[#allocation7 + $0x250] ss:$48 sps:$4 sm:$0xff]  }
  0xb9   :  { %947 = vmatpush1.bf16.msra.mxu0 %v2671_v34  ;;  %988 = vmatpush1.bf16.msra.mxu1 %v2674_v35  ;;  %v2764_v34 = vld [vmem:[#allocation7 + $0x258] ss:$48 sps:$4 sm:$0xff]   ;;  %v2769_v35 = vld [vmem:[#allocation7 + $0x2b4] ss:$48 sps:$4 sm:$0xff]  }
  0xba   :  { %1494 = vmatprep.subr.bf16.mxu0 %v2679_v37  ;;  %1535 = vmatprep.subr.bf16.mxu1 %v2682_v38  ;;  %v2772_v37 = vld [vmem:[#allocation7 + $0x2bc] ss:$48 sps:$4 sm:$0xff]   ;;  %v2767_v38 = vld [vmem:[#allocation7 + $0x2b0] ss:$48 sps:$4 sm:$0xff]  }
  0xbc   :  { %965 = vmatmul.mubr.bf16.vlgmr.msra.gmra.mrb[8].mxu0 %v3160_v36  ;;  %1006 = vmatmul.mubr.bf16.vlgmr.msra.gmra.mrb[8].mxu1 %v3160_v36  ;;  %v2700_v36 = vld [vmem:[#allocation7 + $0x12c] ss:$48 sps:$4 sm:$0xff]  }
  0xbd   :  { %1495 = vmatpush1.bf16.msra.mxu0 %v2677_v39  ;;  %1536 = vmatpush1.bf16.msra.mxu1 %v2680_v40  ;;  %v2770_v39 = vld [vmem:[#allocation7 + $0x2b8] ss:$48 sps:$4 sm:$0xff]   ;;  %v2775_v40 = vld [vmem:[#allocation7 + $0x24] ss:$48 sps:$4 sm:$0xff]  }
  0xbe   :  { %1496 = vmatprep.subr.bf16.mxu0 %v2685_v41  ;;  %1537 = vmatprep.subr.bf16.mxu1 %v2688_v42  ;;  %v2778_v41 = vld [vmem:[#allocation7 + $0x2c] ss:$48 sps:$4 sm:$0xff]   ;;  %v2773_v42 = vld [vmem:[#allocation7 + $0x20] ss:$48 sps:$4 sm:$0xff]  }
  0xbf   :  { %1526 = vmatprep.mubr.bf16.mxu0 %v3050_v0  ;;  %1567 = vmatprep.mubr.bf16.mxu1 %v3050_v0 }
  0xc1   :  { %1497 = vmatpush1.bf16.msra.mxu0 %v2683_v43  ;;  %1538 = vmatpush1.bf16.msra.mxu1 %v2686_v44  ;;  %v2776_v43 = vld [vmem:[#allocation7 + $0x28] ss:$48 sps:$4 sm:$0xff]   ;;  %v2781_v44 = vld [vmem:[#allocation7 + $0x84] ss:$48 sps:$4 sm:$0xff]  }
  0xc2   :  { %1498 = vmatprep.subr.bf16.mxu0 %v2691_v45  ;;  %1539 = vmatprep.subr.bf16.mxu1 %v2694_v46  ;;  %v2784_v45 = vld [vmem:[#allocation7 + $0x8c] ss:$48 sps:$4 sm:$0xff]   ;;  %v2779_v46 = vld [vmem:[#allocation7 + $0x80] ss:$48 sps:$4 sm:$0xff]  }
  0xc5   :  { %1499 = vmatpush1.bf16.msra.mxu0 %v2689_v47  ;;  %1540 = vmatpush1.bf16.msra.mxu1 %v2692_v48  ;;  %v2782_v47 = vld [vmem:[#allocation7 + $0x88] ss:$48 sps:$4 sm:$0xff]   ;;  %v2787_v48 = vld [vmem:[#allocation7 + $0xe4] ss:$48 sps:$4 sm:$0xff]  }
  0xc6   :  { %1500 = vmatprep.subr.bf16.mxu0 %v2697_v49  ;;  %1541 = vmatprep.subr.bf16.mxu1 %v2700_v36  ;;  %v2790_v49 = vld [vmem:[#allocation7 + $0xec] ss:$48 sps:$4 sm:$0xff]   ;;  %v2785_v36 = vld [vmem:[#allocation7 + $0xe0] ss:$48 sps:$4 sm:$0xff]  }
  0xc9   :  { %1501 = vmatpush1.bf16.msra.mxu0 %v2695_v50  ;;  %1542 = vmatpush1.bf16.msra.mxu1 %v2698_v51  ;;  %v2788_v50 = vld [vmem:[#allocation7 + $0xe8] ss:$48 sps:$4 sm:$0xff]   ;;  %v2793_v51 = vld [vmem:[#allocation7 + $0x144] ss:$48 sps:$4 sm:$0xff]  }
  0xca   :  { %1502 = vmatprep.subr.bf16.mxu0 %v2703_v52  ;;  %1543 = vmatprep.subr.bf16.mxu1 %v2706_v53  ;;  %v2796_v52 = vld [vmem:[#allocation7 + $0x14c] ss:$48 sps:$4 sm:$0xff]   ;;  %v2791_v53 = vld [vmem:[#allocation7 + $0x140] ss:$48 sps:$4 sm:$0xff]  }
  0xcd   :  { %1503 = vmatpush1.bf16.msra.mxu0 %v2701_v54  ;;  %1544 = vmatpush1.bf16.msra.mxu1 %v2704_v55  ;;  %v2794_v54 = vld [vmem:[#allocation7 + $0x148] ss:$48 sps:$4 sm:$0xff]   ;;  %v2799_v55 = vld [vmem:[#allocation7 + $0x1a4] ss:$48 sps:$4 sm:$0xff]  }
  0xce   :  { %1504 = vmatprep.subr.bf16.mxu0 %v2709_v56  ;;  %1545 = vmatprep.subr.bf16.mxu1 %v2712_v57  ;;  %v2802_v56 = vld [vmem:[#allocation7 + $0x1ac] ss:$48 sps:$4 sm:$0xff]   ;;  %v2797_v57 = vld [vmem:[#allocation7 + $0x1a0] ss:$48 sps:$4 sm:$0xff]  }
  0xd1   :  { %1505 = vmatpush1.bf16.msra.mxu0 %v2707_v58  ;;  %1546 = vmatpush1.bf16.msra.mxu1 %v2710_v59  ;;  %v2805_v58 = vld [vmem:[#allocation7 + $0x204] ss:$48 sps:$4 sm:$0xff]   ;;  %v2808_v59 = vld [vmem:[#allocation7 + $0x20c] ss:$48 sps:$4 sm:$0xff]  }
  0xd2   :  { %1506 = vmatprep.subr.bf16.mxu0 %v2715_v60  ;;  %1547 = vmatprep.subr.bf16.mxu1 %v2718_v61  ;;  %v2803_v60 = vld [vmem:[#allocation7 + $0x200] ss:$48 sps:$4 sm:$0xff]   ;;  %v2806_v61 = vld [vmem:[#allocation7 + $0x208] ss:$48 sps:$4 sm:$0xff]  }
  0xd5   :  { %1507 = vmatpush1.bf16.msra.mxu0 %v2713_v62  ;;  %1548 = vmatpush1.bf16.msra.mxu1 %v2716_v63  ;;  %v2811_v62 = vld [vmem:[#allocation7 + $0x264] ss:$48 sps:$4 sm:$0xff]   ;;  %v2814_v63 = vld [vmem:[#allocation7 + $0x26c] ss:$48 sps:$4 sm:$0xff]  }
  0xd6   :  { %1508 = vmatprep.subr.bf16.mxu0 %v2721_v1  ;;  %1549 = vmatprep.subr.bf16.mxu1 %v2724_v2  ;;  %v2809_v1 = vld [vmem:[#allocation7 + $0x260] ss:$48 sps:$4 sm:$0xff]   ;;  %v2812_v2 = vld [vmem:[#allocation7 + $0x268] ss:$48 sps:$4 sm:$0xff]  }
  0xd9   :  { %1509 = vmatpush1.bf16.msra.mxu0 %v2719_v3  ;;  %1550 = vmatpush1.bf16.msra.mxu1 %v2722_v4  ;;  %v2817_v3 = vld [vmem:[#allocation7 + $0x2c4] ss:$48 sps:$4 sm:$0xff]   ;;  %v2820_v4 = vld [vmem:[#allocation7 + $0x2cc] ss:$48 sps:$4 sm:$0xff]  }
  0xda   :  { %1576 = vmatprep.subr.bf16.mxu0 %v2727_v6  ;;  %1617 = vmatprep.subr.bf16.mxu1 %v2730_v7  ;;  %v2818_v6 = vld [vmem:[#allocation7 + $0x2c8] ss:$48 sps:$4 sm:$0xff]  }
  0xdc   :  { %1527 = vmatmul.mubr.bf16.vlgmr.msra.gmra.mrb[12].mxu0 %v3174_v9  ;;  %1568 = vmatmul.mubr.bf16.vlgmr.msra.gmra.mrb[12].mxu1 %v3174_v9 }
  0xdd   :  { %1577 = vmatpush1.bf16.msra.mxu0 %v2725_v8  ;;  %1618 = vmatpush1.bf16.msra.mxu1 %v2728_v10 }
  0xde   :  { %1578 = vmatprep.subr.bf16.mxu0 %v2733_v11  ;;  %1619 = vmatprep.subr.bf16.mxu1 %v2736_v12 }
  0xdf   :  { %1608 = vmatprep.mubr.bf16.mxu0 %v3050_v0  ;;  %1649 = vmatprep.mubr.bf16.mxu1 %v3050_v0 }
  0xe1   :  { %1579 = vmatpush1.bf16.msra.mxu0 %v2731_v13  ;;  %1620 = vmatpush1.bf16.msra.mxu1 %v2734_v14 }
  0xe2   :  { %1580 = vmatprep.subr.bf16.mxu0 %v2739_v15  ;;  %1621 = vmatprep.subr.bf16.mxu1 %v2742_v16 }
  0xe5   :  { %1581 = vmatpush1.bf16.msra.mxu0 %v2737_v17  ;;  %1622 = vmatpush1.bf16.msra.mxu1 %v2740_v18 }
  0xe6   :  { %1582 = vmatprep.subr.bf16.mxu0 %v2745_v19  ;;  %1623 = vmatprep.subr.bf16.mxu1 %v2748_v20 }
  0xe9   :  { %1583 = vmatpush1.bf16.msra.mxu0 %v2743_v21  ;;  %1624 = vmatpush1.bf16.msra.mxu1 %v2746_v22 }
  0xea   :  { %1584 = vmatprep.subr.bf16.mxu0 %v2751_v23  ;;  %1625 = vmatprep.subr.bf16.mxu1 %v2754_v24  ;;  %v2821_v23 = vld [vmem:[#allocation10 + $0x40] sm:$0xff]  }
  0xeb   :  { %v2822_v24 = vld [vmem:[#allocation10 + $0xc0] sm:$0xff]  }
  0xed   :  { %1585 = vmatpush1.bf16.msra.mxu0 %v2749_v25  ;;  %1626 = vmatpush1.bf16.msra.mxu1 %v2752_v26  ;;  %v2823_v25 = vld [vmem:[#allocation10] sm:$0xff]  }
  0xee   :  { %1586 = vmatprep.subr.bf16.mxu0 %v2757_v27  ;;  %1627 = vmatprep.subr.bf16.mxu1 %v2760_v28  ;;  %v2824_v26 = vld [vmem:[#allocation10 + $0x80] sm:$0xff]   ;;  %v2825_v27 = vld [vmem:[#allocation10 + $0x48] sm:$0xff]  }
  0xef   :  { %v2826_v28 = vld [vmem:[#allocation10 + $0xc8] sm:$0xff]  }
  0xf1   :  { %1587 = vmatpush1.bf16.msra.mxu0 %v2755_v29  ;;  %1628 = vmatpush1.bf16.msra.mxu1 %v2758_v30  ;;  %v2827_v29 = vld [vmem:[#allocation10 + $0x8] sm:$0xff]  }
  0xf2   :  { %1588 = vmatprep.subr.bf16.mxu0 %v2763_v31  ;;  %1629 = vmatprep.subr.bf16.mxu1 %v2766_v32  ;;  %v2828_v30 = vld [vmem:[#allocation10 + $0x88] sm:$0xff]   ;;  %v2829_v31 = vld [vmem:[#allocation10 + $0x50] sm:$0xff]  }
  0xf3   :  { %v2830_v32 = vld [vmem:[#allocation10 + $0xd0] sm:$0xff]  }
  0xf5   :  { %1589 = vmatpush1.bf16.msra.mxu0 %v2761_v33  ;;  %1630 = vmatpush1.bf16.msra.mxu1 %v2764_v34  ;;  %v2831_v33 = vld [vmem:[#allocation10 + $0x10] sm:$0xff]  }
  0xf6   :  { %1590 = vmatprep.subr.bf16.mxu0 %v2769_v35  ;;  %1631 = vmatprep.subr.bf16.mxu1 %v2772_v37  ;;  %v2832_v34 = vld [vmem:[#allocation10 + $0x90] sm:$0xff]   ;;  %v2833_v35 = vld [vmem:[#allocation10 + $0x58] sm:$0xff]  }
  0xf7   :  { %v2834_v37 = vld [vmem:[#allocation10 + $0xd8] sm:$0xff]  }
  0xf9   :  { %1591 = vmatpush1.bf16.msra.mxu0 %v2767_v38  ;;  %1632 = vmatpush1.bf16.msra.mxu1 %v2770_v39  ;;  %v2835_v38 = vld [vmem:[#allocation10 + $0x18] sm:$0xff]  }
  0xfa   :  { %1658 = vmatprep.subr.bf16.mxu0 %v2775_v40  ;;  %1699 = vmatprep.subr.bf16.mxu1 %v2778_v41  ;;  %v2836_v39 = vld [vmem:[#allocation10 + $0x98] sm:$0xff]   ;;  %v2837_v40 = vld [vmem:[#allocation10 + $0x60] sm:$0xff]  }
  0xfb   :  { %v2838_v41 = vld [vmem:[#allocation10 + $0xe0] sm:$0xff]  }
  0xfc   :  { %1609 = vmatmul.mubr.bf16.vlgmr.msra.gmra.mrb[16].mxu0 %v3174_v9  ;;  %1650 = vmatmul.mubr.bf16.vlgmr.msra.gmra.mrb[16].mxu1 %v3174_v9 }
  0xfd   :  { %1659 = vmatpush1.bf16.msra.mxu0 %v2773_v42  ;;  %1700 = vmatpush1.bf16.msra.mxu1 %v2776_v43  ;;  %v2839_v42 = vld [vmem:[#allocation10 + $0x20] sm:$0xff]  }
  0xfe   :  { %1660 = vmatprep.subr.bf16.mxu0 %v2781_v44  ;;  %1701 = vmatprep.subr.bf16.mxu1 %v2784_v45  ;;  %v2840_v43 = vld [vmem:[#allocation10 + $0xa0] sm:$0xff]   ;;  %v2841_v44 = vld [vmem:[#allocation10 + $0x68] sm:$0xff]  }
  0xff   :  { %1690 = vmatprep.mubr.bf16.mxu0 %v3050_v0  ;;  %1731 = vmatprep.mubr.bf16.mxu1 %v3050_v0  ;;  %v2800_v0 = vld [vmem:[#allocation7 + $0x1a8] ss:$48 sps:$4 sm:$0xff]  }
 0x100   :  { %v2842_v45 = vld [vmem:[#allocation10 + $0xe8] sm:$0xff]  }
 0x101   :  { %1661 = vmatpush1.bf16.msra.mxu0 %v2779_v46  ;;  %1702 = vmatpush1.bf16.msra.mxu1 %v2782_v47  ;;  %v2843_v46 = vld [vmem:[#allocation10 + $0x28] sm:$0xff]  }
 0x102   :  { %1662 = vmatprep.subr.bf16.mxu0 %v2787_v48  ;;  %1703 = vmatprep.subr.bf16.mxu1 %v2790_v49  ;;  %v2844_v47 = vld [vmem:[#allocation10 + $0xa8] sm:$0xff]   ;;  %v2845_v48 = vld [vmem:[#allocation10 + $0x70] sm:$0xff]  }
 0x103   :  { %v2846_v49 = vld [vmem:[#allocation10 + $0xf0] sm:$0xff]  }
 0x105   :  { %1663 = vmatpush1.bf16.msra.mxu0 %v2785_v36  ;;  %1704 = vmatpush1.bf16.msra.mxu1 %v2788_v50  ;;  %v2847_v36 = vld [vmem:[#allocation10 + $0x30] sm:$0xff]  }
 0x106   :  { %1664 = vmatprep.subr.bf16.mxu0 %v2793_v51  ;;  %1705 = vmatprep.subr.bf16.mxu1 %v2796_v52  ;;  %v2848_v50 = vld [vmem:[#allocation10 + $0xb0] sm:$0xff]   ;;  %v2849_v51 = vld [vmem:[#allocation10 + $0x78] sm:$0xff]  }
 0x107   :  { %v2850_v52 = vld [vmem:[#allocation10 + $0xf8] sm:$0xff]  }
 0x109   :  { %1665 = vmatpush1.bf16.msra.mxu0 %v2791_v53  ;;  %1706 = vmatpush1.bf16.msra.mxu1 %v2794_v54 }
 0x10a   :  { %1666 = vmatprep.subr.bf16.mxu0 %v2799_v55  ;;  %1707 = vmatprep.subr.bf16.mxu1 %v2802_v56  ;;  %v2851_v55 = vld [vmem:[#allocation10 + $0x38] sm:$0xff]  }
 0x10b   :  { %v2852_v56 = vld [vmem:[#allocation10 + $0xb8] sm:$0xff]  }
 0x10d   :  { %1667 = vmatpush1.bf16.msra.mxu0 %v2797_v57  ;;  %1708 = vmatpush1.bf16.msra.mxu1 %v2800_v0 }
 0x10e   :  { %1668 = vmatprep.subr.bf16.mxu0 %v2805_v58  ;;  %1709 = vmatprep.subr.bf16.mxu1 %v2808_v59 }
 0x111   :  { %1669 = vmatpush1.bf16.msra.mxu0 %v2803_v60  ;;  %1710 = vmatpush1.bf16.msra.mxu1 %v2806_v61 }
 0x112   :  { %1670 = vmatprep.subr.bf16.mxu0 %v2811_v62  ;;  %1711 = vmatprep.subr.bf16.mxu1 %v2814_v63  ;;  %v1744_v62 = vlaneseq }
 0x114   :  { %v3210_v63 = vshrl.u32 %v1744_v62, 7 }
 0x115   :  { %1671 = vmatpush1.bf16.msra.mxu0 %v2809_v1  ;;  %1712 = vmatpush1.bf16.msra.mxu1 %v2812_v2 }
 0x116   :  { %1672 = vmatprep.subr.bf16.mxu0 %v2817_v3  ;;  %1713 = vmatprep.subr.bf16.mxu1 %v2820_v4  ;;  %v1746_v2 = vsub.s32 0, %v3210_v63 }
 0x119   :  { %1673 = vmatpush1.bf16.msra.mxu0 %v2815_v5  ;;  %1714 = vmatpush1.bf16.msra.mxu1 %v2818_v6  ;;  %v1740_v5 = vld [vmem:[%s3273_s4] sm:$0xff] }
 0x11a   :  { %2478 = vmatprep.subr.bf16.mxu0 %v2821_v23  ;;  %2500 = vmatprep.subr.bf16.mxu1 %v2822_v24 }
 0x11c   :  { %1691 = vmatmul.mubr.bf16.vlgmr.msra.gmra.mrb[20].mxu0 %v3174_v9  ;;  %1732 = vmatmul.mubr.bf16.vlgmr.msra.gmra.mrb[20].mxu1 %v3174_v9 }
 0x11d   :  { %2479 = vmatpush3.bf16.msra.mxu0 %v2823_v25  ;;  %2501 = vmatpush3.bf16.msra.mxu1 %v2824_v26  ;;  %v1747_v25 = vrot.slane %v1740_v5, %v1746_v2 }
 0x11e   :  { %2480 = vmatprep.subr.bf16.mxu0 %v2825_v27  ;;  %2502 = vmatprep.subr.bf16.mxu1 %v2826_v28 }
 0x121   :  { %2481 = vmatpush3.bf16.msra.mxu0 %v2827_v29  ;;  %2503 = vmatpush3.bf16.msra.mxu1 %v2828_v30 }
 0x122   :  { %2482 = vmatprep.subr.bf16.mxu0 %v2829_v31  ;;  %2504 = vmatprep.subr.bf16.mxu1 %v2830_v32 }
 0x125   :  { %2483 = vmatpush3.bf16.msra.mxu0 %v2831_v33  ;;  %2505 = vmatpush3.bf16.msra.mxu1 %v2832_v34 }
 0x126   :  { %2484 = vmatprep.subr.bf16.mxu0 %v2833_v35  ;;  %2506 = vmatprep.subr.bf16.mxu1 %v2834_v37  ;;  %v1762_v37 = vsub.s32 4, %v3210_v63 }
 0x129   :  { %2485 = vmatpush3.bf16.msra.mxu0 %v2835_v38  ;;  %2507 = vmatpush3.bf16.msra.mxu1 %v2836_v39  ;;  %v1770_v38 = vsub.s32 6, %v3210_v63 }
 0x12a   :  { %2486 = vmatprep.subr.bf16.mxu0 %v2837_v40  ;;  %2508 = vmatprep.subr.bf16.mxu1 %v2838_v41  ;;  %v1766_v40 = vsub.s32 5, %v3210_v63  ;;  %v1774_v41 = vsub.s32 7, %v3210_v63 }
 0x12d   :  { %2487 = vmatpush3.bf16.msra.mxu0 %v2839_v42  ;;  %2509 = vmatpush3.bf16.msra.mxu1 %v2840_v43 }
 0x12e   :  { %2488 = vmatprep.subr.bf16.mxu0 %v2841_v44  ;;  %2510 = vmatprep.subr.bf16.mxu1 %v2842_v45 }
 0x131   :  { %2489 = vmatpush3.bf16.msra.mxu0 %v2843_v46  ;;  %2511 = vmatpush3.bf16.msra.mxu1 %v2844_v47  ;;  %v1763_v46 = vrot.slane %v1740_v5, %v1762_v37  ;;  %v1771_v47 = vrot.slane %v1740_v5, %v1770_v38 }
 0x132   :  { %2490 = vmatprep.subr.bf16.mxu0 %v2845_v48  ;;  %2512 = vmatprep.subr.bf16.mxu1 %v2846_v49 }
 0x135   :  { %2491 = vmatpush3.bf16.msra.mxu0 %v2847_v36  ;;  %2513 = vmatpush3.bf16.msra.mxu1 %v2848_v50  ;;  %v1767_v50 = vrot.slane %v1740_v5, %v1766_v40 }
 0x136   :  { %2492 = vmatprep.subr.bf16.mxu0 %v2849_v51  ;;  %2514 = vmatprep.subr.bf16.mxu1 %v2850_v52  ;;  %v1775_v51 = vrot.slane %v1740_v5, %v1774_v41 }
 0x139   :  { %2493 = vmatpush3.bf16.msra.mxu0 %v2851_v55  ;;  %2515 = vmatpush3.bf16.msra.mxu1 %v2852_v56 }
 0x14f   :  { %v3186_v7 = vpop.f32.mrb[0].mxu0  ;;  %v3188_v8 = vpop.f32.mrb[0].mxu1 }
 0x150   :  { %v3190_v10 = vpop.f32.mrb[1].mxu0  ;;  %v3192_v11 = vpop.f32.mrb[1].mxu1 }
 0x151   :  { %v806_v12 = vpop.f32.mrb[2].mxu0  ;;  %v847_v13 = vpop.f32.mrb[2].mxu1 }
 0x152   :  { %v807_v14 = vpop.f32.mrb[3].mxu0  ;;  %v848_v15 = vpop.f32.mrb[3].mxu1  ;;  %v1754_v12 = vsub.s32 2, %v3210_v63 }
 0x16f   :  { %v3194_v16 = vpop.f32.mrb[4].mxu0  ;;  %v3196_v17 = vpop.f32.mrb[4].mxu1 }
 0x170   :  { %v3198_v18 = vpop.f32.mrb[5].mxu0  ;;  %v3200_v19 = vpop.f32.mrb[5].mxu1 }
 0x171   :  { %v888_v9 = vpop.f32.mrb[6].mxu0  ;;  %v929_v20 = vpop.f32.mrb[6].mxu1 }
 0x172   :  { %v889_v21 = vpop.f32.mrb[7].mxu0  ;;  %v930_v22 = vpop.f32.mrb[7].mxu1  ;;  %v1750_v9 = vsub.s32 1, %v3210_v63 }
 0x174   :  { %v1751_v26 = vrot.slane %v1740_v5, %v1750_v9 }
 0x18f   :  { %v3202_v53 = vpop.f32.mrb[8].mxu0  ;;  %v3204_v54 = vpop.f32.mrb[8].mxu1 }
 0x190   :  { %v3206_v57 = vpop.f32.mrb[9].mxu0  ;;  %v3208_v0 = vpop.f32.mrb[9].mxu1 }
 0x191   :  { %v970_v58 = vpop.f32.mrb[10].mxu0  ;;  %v1011_v59 = vpop.f32.mrb[10].mxu1 }
 0x192   :  { %v971_v60 = vpop.f32.mrb[11].mxu0  ;;  %v1012_v61 = vpop.f32.mrb[11].mxu1 }
 0x1af   :  { %v1528_v1 = vpop.f32.mrb[12].mxu0  ;;  %v1569_v3 = vpop.f32.mrb[12].mxu1 }
 0x1b0   :  { %v1529_v4 = vadd.f32 %v1528_v1, %v3186_v7  ;;  %v1570_v6 = vadd.f32 %v1569_v3, %v3188_v8  ;;  %v1530_v13 = vpop.f32.mrb[13].mxu0  ;;  %v1571_v14 = vpop.f32.mrb[13].mxu1  ;;  %v1758_v7 = vsub.s32 3, %v3210_v63  ;;  %v1755_v8 = vrot.slane %v1740_v5, %v1754_v12 }
 0x1b1   :  { %v1531_v15 = vadd.f32 %v1530_v13, %v3190_v10  ;;  %v1572_v20 = vadd.f32 %v1571_v14, %v3192_v11  ;;  %v1532_v21 = vpop.f32.mrb[14].mxu0  ;;  %v1573_v22 = vpop.f32.mrb[14].mxu1 }
 0x1b2   :  { %v1533_v23 = vpop.f32.mrb[15].mxu0  ;;  %v1574_v24 = vpop.f32.mrb[15].mxu1  ;;  %v1759_v10 = vrot.slane %v1740_v5, %v1758_v7  ;;  %v1804_v27 = vadd.f32 %v1747_v25, %v1529_v4  ;;  %v1806_v11 = vadd.f32 %v1755_v8, %v1570_v6  ;;  %v1741_v8 = vld [vmem:[%s3273_s4 + $0x8] sm:$0xf] }
 0x1b3   :  { %v1805_v28 = vadd.f32 %v1751_v26, %v1531_v15  ;;  %v1779_v26 = vrot.slane %v1741_v8, %v1746_v2 }
 0x1b4   :  { %v1807_v29 = vadd.f32 %v1759_v10, %v1572_v20  ;;  %v2437_v30 = vmul.f32 -1.442695, %v1804_v27  ;;  %v2439_v31 = vmul.f32 -1.442695, %v1806_v11  ;;  %v1787_v10 = vrot.slane %v1741_v8, %v1754_v12 }
 0x1b5   :  { %v2438_v32 = vmul.f32 -1.442695, %v1805_v28  ;;  %v1783_v28 = vrot.slane %v1741_v8, %v1750_v9 }
 0x1b6   :  { %v2440_v33 = vmul.f32 -1.442695, %v1807_v29  ;;  %2853 = vpow2.f32 %v2437_v30  ;;  %v1791_v29 = vrot.slane %v1741_v8, %v1758_v7 }
 0x1b7   :  { %2855 = vpow2.f32 %v2439_v31 }
 0x1b8   :  { %2857 = vpow2.f32 %v2438_v32 }
 0x1b9   :  { %2859 = vpow2.f32 %v2440_v33 }
 0x1c0   :  { %v2854_v34 = vpop.eup %2853 }
 0x1c1   :  { %v2856_v35 = vpop.eup %2855  ;;  %v1828_v43 = vadd.f32 1.0, %v2854_v34 }
 0x1c2   :  { %v2858_v39 = vpop.eup %2857  ;;  %v1830_v44 = vadd.f32 1.0, %v2856_v35 }
 0x1c3   :  { %v2860_v42 = vpop.eup %2859  ;;  %v1829_v45 = vadd.f32 1.0, %v2858_v39  ;;  %2861 = vrcp.f32 %v1828_v43 }
 0x1c4   :  { %v1831_v48 = vadd.f32 1.0, %v2860_v42  ;;  %2863 = vrcp.f32 %v1830_v44 }
 0x1c5   :  { %2865 = vrcp.f32 %v1829_v45 }
 0x1c6   :  { %2867 = vrcp.f32 %v1831_v48 }
 0x1cf   :  { %v1610_v49 = vpop.f32.mrb[16].mxu0  ;;  %v1651_v36 = vpop.f32.mrb[16].mxu1 }
 0x1d0   :  { %v1611_v52 = vadd.f32 %v1610_v49, %v3194_v16  ;;  %v1652_v55 = vadd.f32 %v1651_v36, %v3196_v17  ;;  %v1612_v56 = vpop.f32.mrb[17].mxu0  ;;  %v1653_v58 = vpop.f32.mrb[17].mxu1 }
 0x1d1   :  { %v1613_v59 = vadd.f32 %v1612_v56, %v3198_v18  ;;  %v1654_v60 = vadd.f32 %v1653_v58, %v3200_v19  ;;  %v1614_v61 = vpop.f32.mrb[18].mxu0  ;;  %v1655_v62 = vpop.f32.mrb[18].mxu1 }
 0x1d2   :  { %v1808_v1 = vadd.f32 %v1763_v46, %v1611_v52  ;;  %v1810_v3 = vadd.f32 %v1771_v47, %v1652_v55  ;;  %v1615_v4 = vpop.f32.mrb[19].mxu0  ;;  %v1656_v6 = vpop.f32.mrb[19].mxu1 }
 0x1d3   :  { %v1809_v5 = vadd.f32 %v1767_v50, %v1613_v59  ;;  %v1811_v13 = vadd.f32 %v1775_v51, %v1654_v60  ;;  %v2862_v16 = vpop.eup %2861 }
 0x1d4   :  { %2869 = vtanh.f32 %v1808_v1  ;;  %v2864_v17 = vpop.eup %2863 }
 0x1d5   :  { %2871 = vtanh.f32 %v1810_v3  ;;  %v2866_v14 = vpop.eup %2865 }
 0x1d6   :  { %2873 = vtanh.f32 %v1809_v5  ;;  %v2868_v18 = vpop.eup %2867 }
 0x1d7   :  { %2875 = vtanh.f32 %v1811_v13  ;;  %v2445_v13 = vld [vmem:[%s3275_s6] ss:$0 sm:$0xff] }
 0x1de   :  { %v2870_v15 = vpop.eup %2869 }
 0x1df   :  { %v2872_v19 = vpop.eup %2871  ;;  %v1868_v20 = vmul.f32 %v2870_v15, %v2862_v16 }
 0x1e0   :  { %v2874_v21 = vpop.eup %2873  ;;  %v1870_v22 = vmul.f32 %v2872_v19, %v2864_v17 }
 0x1e1   :  { %v2876_v23 = vpop.eup %2875  ;;  %v1869_v24 = vmul.f32 %v2874_v21, %v2866_v14 }
 0x1e2   :  { %v1871_v25 = vmul.f32 %v2876_v23, %v2868_v18 }
 0x1ef   :  { %v1692_v27 = vpop.f32.mrb[20].mxu0  ;;  %v1733_v11 = vpop.f32.mrb[20].mxu1 }
 0x1f0   :  { %v1693_v30 = vadd.f32 %v1692_v27, %v3202_v53  ;;  %v1734_v31 = vadd.f32 %v1733_v11, %v3204_v54  ;;  %v1694_v32 = vpop.f32.mrb[21].mxu0  ;;  %v1735_v33 = vpop.f32.mrb[21].mxu1 }
 0x1f1   :  { %v1695_v34 = vadd.f32 %v1694_v32, %v3206_v57  ;;  %v1736_v2 = vadd.f32 %v1735_v33, %v3208_v0  ;;  %v1696_v35 = vpop.f32.mrb[22].mxu0  ;;  %v1737_v12 = vpop.f32.mrb[22].mxu1 }
 0x1f2   :  { %v1812_v37 = vadd.f32 %v1779_v26, %v1693_v30  ;;  %v1814_v38 = vadd.f32 %v1787_v10, %v1734_v31  ;;  %v1697_v39 = vpop.f32.mrb[23].mxu0  ;;  %v1738_v40 = vpop.f32.mrb[23].mxu1 }
 0x1f3   :  { %v1813_v9 = vadd.f32 %v1783_v28, %v1695_v34  ;;  %v1815_v41 = vadd.f32 %v1791_v29, %v1736_v2 }
 0x1f4   :  { %v2441_v63 = vmul.f32 -1.442695, %v1812_v37  ;;  %v2443_v7 = vmul.f32 -1.442695, %v1814_v38 }
 0x1f5   :  { %v2442_v42 = vmul.f32 -1.442695, %v1813_v9  ;;  %v2444_v53 = vmul.f32 -1.442695, %v1815_v41 }
 0x1f6   :  { %2877 = vpow2.f32 %v2441_v63 }
 0x1f7   :  { %2879 = vpow2.f32 %v2443_v7 }
 0x1f8   :  { %2881 = vpow2.f32 %v2442_v42 }
 0x1f9   :  { %2883 = vpow2.f32 %v2444_v53 }
 0x1fa   :  { %2885 = vtanh.f32 %v1868_v20 }
 0x1fb   :  { %2887 = vtanh.f32 %v1870_v22 }
 0x1fc   :  { %2889 = vtanh.f32 %v1869_v24 }
 0x1fd   :  { %2891 = vtanh.f32 %v1871_v25 }
 0x200   :  { %v2878_v54 = vpop.eup %2877 }
 0x201   :  { %v2880_v57 = vpop.eup %2879  ;;  %v1856_v0 = vadd.f32 1.0, %v2878_v54 }
 0x202   :  { %v2882_v43 = vpop.eup %2881  ;;  %v1858_v44 = vadd.f32 1.0, %v2880_v57 }
 0x203   :  { %v2884_v45 = vpop.eup %2883  ;;  %2893 = vrcp.f32 %v1856_v0  ;;  %v1857_v46 = vadd.f32 1.0, %v2882_v43 }
 0x204   :  { %2895 = vrcp.f32 %v1858_v44  ;;  %v1859_v47 = vadd.f32 1.0, %v2884_v45  ;;  %v2886_v48 = vpop.eup %2885 }
 0x205   :  { %2897 = vrcp.f32 %v1857_v46  ;;  %v2888_v49 = vpop.eup %2887 }
 0x206   :  { %2899 = vrcp.f32 %v1859_v47  ;;  %v2890_v36 = vpop.eup %2889 }
 0x207   :  { %v2892_v50 = vpop.eup %2891 }
 0x20d   :  { %v2894_v51 = vpop.eup %2893 }
 0x20e   :  { %v2896_v52 = vpop.eup %2895  ;;  %v1876_v55 = vmul.f32 %v2894_v51, %v2886_v48 }
 0x20f   :  { %v2898_v56 = vpop.eup %2897  ;;  %v1878_v58 = vmul.f32 %v2896_v52, %v2888_v49 }
 0x210   :  { %v2900_v59 = vpop.eup %2899  ;;  %v1877_v60 = vmul.f32 %v2898_v56, %v2890_v36  ;;  %v1880_v3 = vpack.c.bf16 %v1876_v55, %v1876_v55 }
 0x211   :  { %v1879_v61 = vmul.f32 %v2900_v59, %v2892_v50  ;;  %v1882_v4 = vpack.c.bf16 %v1878_v58, %v1878_v58 }
 0x212   :  { %v1881_v62 = vpack.c.bf16 %v1877_v60, %v1877_v60 }
 0x213   :  { %v1883_v1 = vpack.c.bf16 %v1879_v61, %v1879_v61 }
 0x214   :  { %2179 = vmatprep.mubr.bf16.mxu0 %v1881_v62 }
 0x215   :  { %2219 = vmatprep.mubr.bf16.mxu1 %v1883_v1  ;;  %2180 = vmatmul.mubr.bf16.vlgmr.msra.gmra.mrb[24].mxu0 %v1880_v3 }
 0x216   :  { %2220 = vmatmul.mubr.bf16.vlgmr.msra.gmra.mrb[24].mxu1 %v1882_v4 }
 0x2e8   :  { %v2494_v6 = vpop.f32.mrb[24].mxu0 }
 0x2e9   :  { %v2516_v5 = vpop.f32.mrb[24].mxu1  ;;  %v2495_v16 = vpop.f32.mrb[25].mxu0 }
 0x2ea   :  { %v2496_v17 = vadd.f32 %v2495_v16, %v2494_v6  ;;  %v2517_v14 = vpop.f32.mrb[25].mxu1  ;;  %v2497_v18 = vpop.f32.mrb[26].mxu0 }
 0x2eb   :  { %v2518_v15 = vadd.f32 %v2517_v14, %v2516_v5  ;;  %v2519_v19 = vpop.f32.mrb[26].mxu1  ;;  %v2498_v20 = vpop.f32.mrb[27].mxu0 }
 0x2ec   :  { %v2182_v21 = vadd.f32 %v2496_v17, %v2445_v13  ;;  %v2520_v22 = vpop.f32.mrb[27].mxu1 }
 0x2ee   :  { %v2222_v23 = vadd.f32 %v2518_v15, %v2182_v21 }
 0x2f0   :  { %2227 = vst [vmem:[#allocation11] sm:$0xf] %v2222_v23 }
 0x2f1   :  { %3022 = shalt.err (!%p3019_p2)
}
 0x2f2   :  { %s3023_s22 = scalar_lea.hbm %s3276_s7, 64 }
 0x2f3   :  { %p3024_p3 = scmp.ne.s32.totalorder %s3276_s7, %s3023_s22  ;;  %p3027_p4 = scmp.lt.u32.totalorder %s3023_s22, %s3276_s7 }
 0x2f5   :  { %p3029_p5 = pnand %p3027_p4, %p3024_p3 }
 0x2f7   :  { %3032 = shalt.err (!%p3029_p5)
}
 0x2f8   :  { %2237 = dma.vmem_to_hbm [thread:$0]  %s2235_s19, 64, %s3276_s7, [#allocation4]  }
 0x2f9   :  { %3039 = dma.done.wait [#allocation4], 64  }
 0x2fa   :  { %3040 = vsyncadd [#allocation4], 4294967232 }
 0x2fb   :  { %2241 = vsyncpa [#allocation3], 1 }
 0x2fc   :  { %2242 = vsyncpa [#allocation6], 1 }
 0x2fd   :  { %2243 = vsyncpa [#allocation9], 1 }
 0x2fe   :  { %2244 = vsyncpa [#allocation4], 1 }

</bundles_post_ra>
